<compile_context>
chip_gen: v7x
topology: tpu7x:2x2x1
jax: 0.10.0
libtpu: 0.0.40
codegen_flags: <defaults>
</compile_context>

<pallas_src>
import functools

import jax
import jax.numpy as jnp
from jax.experimental import pallas as pl
from jax.experimental.pallas import tpu as pltpu

_VREG_ELEMS = 8 * 128      # one int32 vreg
_MAX_BLOCK_ROWS = 512      # (512, 128) int32 = 256 KiB per block, VMEM-safe on all gens


def _uniform_noise_kernel(bits_ref, out_ref, *, size_n: int):
    """Reduce raw uniform 32-bit draws to action indices in [0, size_n)."""
    bits = bits_ref[...]  # uint32, (block_rows, 128)
    if size_n & (size_n - 1) == 0:
        # Power of two: single VALU AND (no integer modulo on the VPU).
        out_ref[...] = (bits & jnp.uint32(size_n - 1)).astype(jnp.int32)
    else:
        # General size_n: top-23-bit mul-and-floor (~3 VPU ops, no division).
        # (bits >> 9) < 2^23 so it is exactly representable in f32; the cast
        # truncates toward zero which is floor for non-negative values.
        u = (bits >> jnp.uint32(9)).astype(jnp.int32).astype(jnp.float32)
        out_ref[...] = (u * jnp.float32(size_n / 2.0**23)).astype(jnp.int32)


def uniform_discrete_noise_sample(obs: jax.Array, key: jax.Array, size_n: int) -> jax.Array:
    """Pallas equivalent of UniformDiscreteNoise.sample(sample).

    Args:
        obs: observation batch, shape (batch, hidden). Only batch size is used
             (the noise does not depend on the observation, as in PyTorch).
        key: jax.random key (deterministic replacement for np.random.default_rng).
        size_n: number of discrete actions.

    Returns:
        int32 array of shape (batch,) with values in [0, size_n).
    """
    batch = obs.shape[0]

    # Pad to a lane/sublane-aligned (rows, 128) int32 layout, rows % 8 == 0.
    rows = pl.cdiv(batch, _VREG_ELEMS) * 8
    block_rows = min(rows, _MAX_BLOCK_ROWS)
    rows = pl.cdiv(rows, block_rows) * block_rows
    grid = rows // block_rows

    # Uniform raw bits from the surrounding JAX program (fuses into the jit).
    bits = jax.random.bits(key, (rows, 128), dtype=jnp.uint32)

    actions_tile = pl.pallas_call(
        functools.partial(_uniform_noise_kernel, size_n=size_n),
        out_shape=jax.ShapeDtypeStruct((rows, 128), jnp.int32),
        grid=(grid,),
        in_specs=[pl.BlockSpec((block_rows, 128), lambda i: (i, 0))],
        out_specs=pl.BlockSpec((block_rows, 128), lambda i: (i, 0)),
        compiler_params=pltpu.CompilerParams(
            dimension_semantics=("parallel",)),  # shards across v7x's 2 TCs
    )(bits)

    # Pallas-side consumers can keep the lane-dense (rows, 128) tile as-is;
    # slice here to match the module's per-element sample() return shape.
    return actions_tile.reshape(-1)[:batch]


if __name__ == "__main__":
    key = jax.random.PRNGKey(0)
    k_obs, k_pow2, k_gen = jax.random.split(key, 3)

    batch, hidden = 2, 32

    # Deterministic example "sample" TensorDict content (observations).
    obs = jax.random.normal(k_obs, (batch, hidden), dtype=jnp.float32)

    # Power-of-two action count (AND path).
    size_n = 4
    actions = jax.block_until_ready(uniform_discrete_noise_sample(obs, k_pow2, size_n))
    assert actions.shape == (batch,), actions.shape
    assert actions.dtype == jnp.int32, actions.dtype
    assert bool(jnp.all(actions >= 0)) and bool(jnp.all(actions < size_n)), actions

    # Non-power-of-two action count (mul-and-floor path).
    size_n = 5
    actions = jax.block_until_ready(uniform_discrete_noise_sample(obs, k_gen, size_n))
    assert actions.shape == (batch,), actions.shape
    assert actions.dtype == jnp.int32, actions.dtype
    assert bool(jnp.all(actions >= 0)) and bool(jnp.all(actions < size_n)), actions

    print("KERNEL_OK")
</pallas_src>

<mosaic_0001>
module attributes {stable_mosaic.version = 11 : i64} {
  func.func @_uniform_noise_kernel(%arg0: i32, %arg1: memref<8x128xi32, #tpu.memory_space<vmem>>, %arg2: memref<8x128xi32, #tpu.memory_space<vmem>>) attributes {dimension_semantics = [#tpu.dimension_semantics<parallel>], iteration_bounds = array<i64: 1>, scalar_prefetch = 0 : i64, scratch_operands = 0 : i64, tpu.core_type = #tpu.core_type<tc>, window_params = [{transform_indices = @transform_0, window_bounds = array<i64: 8, 128>}, {transform_indices = @transform_1, window_bounds = array<i64: 8, 128>}]} {
    %c0 = arith.constant 0 : index
    %c0_0 = arith.constant 0 : index
    %0 = vector.load %arg1[%c0, %c0_0] : memref<8x128xi32, #tpu.memory_space<vmem>>, vector<8x128xi32>
    %c3_i32 = arith.constant 3 : i32
    %1 = vector.broadcast %c3_i32 : i32 to vector<8x128xi32>
    %2 = arith.andi %0, %1 : vector<8x128xi32>
    %c0_1 = arith.constant 0 : index
    %c0_2 = arith.constant 0 : index
    %3 = vector.load %arg2[%c0_1, %c0_2] : memref<8x128xi32, #tpu.memory_space<vmem>>, vector<8x128xi32>
    tpu.vector_store %arg2[%c0_1, %c0_2], %2 {strides = array<i32>} : memref<8x128xi32, #tpu.memory_space<vmem>>, vector<8x128xi32>,
    return
  }
  func.func @transform_0(%arg0: i32) -> (i32, i32) {
    %c0_i32 = arith.constant 0 : i32
    %c0_i32_0 = arith.constant 0 : i32
    return %arg0, %c0_i32 : i32, i32
  }
  func.func @transform_1(%arg0: i32) -> (i32, i32) {
    %c0_i32 = arith.constant 0 : i32
    %c0_i32_0 = arith.constant 0 : i32
    return %arg0, %c0_i32 : i32, i32
  }
}

</mosaic_0001>

<bundles_post_ra>
// kernel: tpu_custom_call.1
= control target key start
LH: loop header
LB: loop body
LE: loop exit
PB: predicated region body
PF: predicated region fallthrough
CT: control target
= control target key end

     0   :  { %6 = vsyncpa [#allocation3], 0  ;;  %s125_s0 = inlined_call_operand.hbm [shape: u32[8,128], index: 0, kind: input, shape index: {}]   ;;  %s126_s1 = inlined_call_operand.hbm [shape: s32[8,128], index: 1, kind: output, shape index: {}]  }
   0x1   :  { %7 = vsyncpa [#allocation4], 0  ;;  %s89_s6 = smov [#allocation2]   ;;  %s41_s10 = scalar_lea.hbm %s125_s0, 128 }
   0x2   :  { %s14_s7 = sshll.u32 %s89_s6, 4  ;;  %p42_p0 = scmp.ne.s32.totalorder %s125_s0, %s41_s10  ;;  %s15_s7 = int_to_ptr.vmem [resolvable:$true] %s14_s7 }
   0x3   :  { %p45_p1 = scmp.lt.u32.totalorder %s41_s10, %s125_s0 }
   0x5   :  { %p47_p2 = pnand %p45_p1, %p42_p0 }
   0x7   :  { %50 = shalt.err (!%p47_p2)
}
   0x8   :  { %s51_s15 = scalar_lea.vmem %s15_s7, 128  ;;  %p56_p4 = scmp.lt.s32.totalorder %s15_s7, %s15_s7 }
   0x9   :  { %p52_p3 = scmp.ne.s32.totalorder %s15_s7, %s51_s15  ;;  %p57_p5 = scmp.lt.s32.totalorder %s51_s15, %s51_s15 }
   0xb   :  { %p58_p6 = por %p57_p5, %p56_p4 }
   0xd   :  { %p59_p7 = pnand %p58_p6, %p52_p3 }
   0xf   :  { %62 = shalt.err (!%p59_p7)
}
  0x10   :  { %17 = dma.hbm_to_vmem [thread:$0]  %s125_s0, 128, %s15_s7, [#allocation3]  }
  0x11   :  { %85 = dma.done.wait [#allocation3], 128  }
  0x12   :  { %86 = vsyncadd [#allocation3], 4294967168  ;;  %s90_s18 = smov [#allocation5]   ;;  %v21_v0 = vld [vmem:[#allocation2] sm:$0xff] }
  0x13   :  { %s30_s19 = sshll.u32 %s90_s18, 4  ;;  %v22_v1 = vand.u32 3, %v21_v0  ;;  %s31_s19 = int_to_ptr.vmem [resolvable:$true] %s30_s19 }
  0x14   :  { %s63_s20 = scalar_lea.vmem %s31_s19, 128  ;;  %p68_p9 = scmp.lt.s32.totalorder %s31_s19, %s31_s19 }
  0x15   :  { %23 = vst [vmem:[#allocation5] sm:$0xff] %v22_v1  ;;  %p64_p8 = scmp.ne.s32.totalorder %s31_s19, %s63_s20  ;;  %p69_p10 = scmp.lt.s32.totalorder %s63_s20, %s63_s20 }
  0x17   :  { %p70_p11 = por %p69_p10, %p68_p9 }
  0x19   :  { %p71_p12 = pnand %p70_p11, %p64_p8 }
  0x1b   :  { %74 = shalt.err (!%p71_p12)
}
  0x1c   :  { %s75_s23 = scalar_lea.hbm %s126_s1, 128 }
  0x1d   :  { %p76_p13 = scmp.ne.s32.totalorder %s126_s1, %s75_s23  ;;  %p79_p0 = scmp.lt.u32.totalorder %s75_s23, %s126_s1 }
  0x1f   :  { %p81_p1 = pnand %p79_p0, %p76_p13 }
  0x21   :  { %84 = shalt.err (!%p81_p1)
}
  0x22   :  { %33 = dma.vmem_to_hbm [thread:$0]  %s31_s19, 128, %s126_s1, [#allocation4]  }
  0x23   :  { %87 = dma.done.wait [#allocation4], 128  }
  0x24   :  { %88 = vsyncadd [#allocation4], 4294967168 }
  0x25   :  { %37 = vsyncpa [#allocation3], 1 }
  0x26   :  { %38 = vsyncpa [#allocation4], 1 }

</bundles_post_ra>
